<compile_context>
chip_gen: v6e
topology: v6e:2x2x1
jax: 0.10.0
libtpu: 0.0.40
codegen_flags: <defaults>
</compile_context>

<pallas_src>
import functools
import math

import jax
import jax.numpy as jnp
from jax.experimental import pallas as pl
from jax.experimental.pallas import tpu as pltpu

LEN_GAME_STATE = 32
N_ACTIONS = 9


def _mlp_kernel(x_ref, w1_ref, b1_ref, w2_ref, b2_ref, w3_ref, b3_ref, o_ref):
    # x tile: (tb, LEN_GAME_STATE) f32; weights/biases f32 (VMEM-resident);
    # output tile: (tb, 9) f32.  All compute stays f32 (memory-bound kernel).
    x = x_ref[...]

    h = jnp.dot(x, w1_ref[...], preferred_element_type=jnp.float32) + b1_ref[...]
    h = jnp.maximum(h, 0.0)

    h = jnp.dot(h, w2_ref[...], preferred_element_type=jnp.float32) + b2_ref[...]
    h = jnp.maximum(h, 0.0)

    h = jnp.dot(h, w3_ref[...], preferred_element_type=jnp.float32) + b3_ref[...]
    h = jnp.maximum(h, 0.0)

    o_ref[...] = h.astype(o_ref.dtype)


def _round_up(n, m):
    return (n + m - 1) // m * m


@functools.partial(jax.jit, static_argnames=("block_b",))
def chaser_forward(x, params, *, block_b=4096):
    """x: (B, LEN_GAME_STATE) float32 -> (B, 9) float32."""
    w1, b1, w2, b2, w3, b3 = params
    B = x.shape[0]

    # Batch tile: multiple of 8 (sublane alignment); edge tile handled by
    # Pallas masking, so no explicit padding of x or slicing of the output.
    tb = min(block_b, _round_up(B, 8))
    grid = (pl.cdiv(B, tb),)

    resident = lambda a: pl.BlockSpec(a.shape, lambda i: (0, 0))

    out = pl.pallas_call(
        _mlp_kernel,
        out_shape=jax.ShapeDtypeStruct((B, N_ACTIONS), jnp.float32),
        grid=grid,
        in_specs=[
            pl.BlockSpec((tb, LEN_GAME_STATE), lambda i: (i, 0)),  # streamed x tiles
            resident(w1), resident(b1),                            # VMEM-resident params
            resident(w2), resident(b2),
            resident(w3), resident(b3),
        ],
        out_specs=pl.BlockSpec((tb, N_ACTIONS), lambda i: (i, 0)),
        compiler_params=pltpu.CompilerParams(
            # Megacore sharding of the batch axis on v7x; no-op on v5e/v6e.
            # TODO(synk): if profiling on v7x shows one idle TC, switch to
            # pltpu.CORE_PARALLEL on this axis.
            dimension_semantics=("parallel",)),
    )(x, w1, b1, w2, b2, w3, b3)

    return out


def _xavier_uniform(key, fan_in, fan_out):
    # Matches nn.init.xavier_uniform_ for a (out, in) weight; stored
    # transposed as (in, out) since the kernel computes x @ W.
    bound = math.sqrt(6.0 / (fan_in + fan_out))
    return jax.random.uniform(key, (fan_in, fan_out), jnp.float32, -bound, bound)


def _linear_bias(key, fan_in, fan_out):
    # PyTorch nn.Linear default bias init: U(-1/sqrt(fan_in), 1/sqrt(fan_in)).
    bound = 1.0 / math.sqrt(fan_in)
    return jax.random.uniform(key, (1, fan_out), jnp.float32, -bound, bound)


def init_params(key):
    k = jax.random.split(key, 6)
    w1 = _xavier_uniform(k[0], LEN_GAME_STATE, LEN_GAME_STATE)
    b1 = _linear_bias(k[1], LEN_GAME_STATE, LEN_GAME_STATE)
    w2 = _xavier_uniform(k[2], LEN_GAME_STATE, LEN_GAME_STATE)
    b2 = _linear_bias(k[3], LEN_GAME_STATE, LEN_GAME_STATE)
    w3 = _xavier_uniform(k[4], LEN_GAME_STATE, N_ACTIONS)
    b3 = _linear_bias(k[5], LEN_GAME_STATE, N_ACTIONS)
    return (w1, b1, w2, b2, w3, b3)


def _reference(x, params):
    # Pure-JAX f32 reference with PyTorch forward semantics.
    w1, b1, w2, b2, w3, b3 = params
    h = jnp.maximum(x @ w1 + b1, 0.0)
    h = jnp.maximum(h @ w2 + b2, 0.0)
    h = jnp.maximum(h @ w3 + b3, 0.0)
    return h


if __name__ == "__main__":
    key = jax.random.PRNGKey(0)
    k_params, k_x1, k_x2 = jax.random.split(key, 3)

    params = init_params(k_params)

    # Primary small-shape check (B=2, ragged vs the 8-row tile -> exercises
    # edge-block masking with a single grid step).
    B = 2
    x = jax.random.normal(k_x1, (B, LEN_GAME_STATE), jnp.float32)
    y = jax.block_until_ready(chaser_forward(x, params))
    assert y.shape == (B, N_ACTIONS)
    assert jnp.allclose(y, _reference(x, params), atol=1e-4, rtol=1e-4)

    # Secondary check: multiple grid steps + ragged last tile.
    B2 = 300
    x2 = jax.random.normal(k_x2, (B2, LEN_GAME_STATE), jnp.float32)
    y2 = jax.block_until_ready(chaser_forward(x2, params, block_b=128))
    assert y2.shape == (B2, N_ACTIONS)
    assert jnp.allclose(y2, _reference(x2, params), atol=1e-4, rtol=1e-4)

    print("KERNEL_OK")
</pallas_src>

<mosaic_0001>
module attributes {stable_mosaic.version = 11 : i64} {
  func.func @_mlp_kernel(%arg0: i32, %arg1: memref<8x32xf32, #tpu.memory_space<vmem>>, %arg2: memref<32x32xf32, #tpu.memory_space<vmem>>, %arg3: memref<1x32xf32, #tpu.memory_space<vmem>>, %arg4: memref<32x32xf32, #tpu.memory_space<vmem>>, %arg5: memref<1x32xf32, #tpu.memory_space<vmem>>, %arg6: memref<32x9xf32, #tpu.memory_space<vmem>>, %arg7: memref<1x9xf32, #tpu.memory_space<vmem>>, %arg8: memref<8x9xf32, #tpu.memory_space<vmem>>) attributes {dimension_semantics = [#tpu.dimension_semantics<parallel>], iteration_bounds = array<i64: 1>, scalar_prefetch = 0 : i64, scratch_operands = 0 : i64, tpu.core_type = #tpu.core_type<tc>, window_params = [{transform_indices = @transform_0, window_bounds = array<i64: 8, 32>}, {pipeline_mode = #tpu.pipeline_mode<synchronous>, transform_indices = @transform_1, window_bounds = array<i64: 32, 32>}, {pipeline_mode = #tpu.pipeline_mode<synchronous>, transform_indices = @transform_2, window_bounds = array<i64: 1, 32>}, {pipeline_mode = #tpu.pipeline_mode<synchronous>, transform_indices = @transform_3, window_bounds = array<i64: 32, 32>}, {pipeline_mode = #tpu.pipeline_mode<synchronous>, transform_indices = @transform_4, window_bounds = array<i64: 1, 32>}, {pipeline_mode = #tpu.pipeline_mode<synchronous>, transform_indices = @transform_5, window_bounds = array<i64: 32, 9>}, {pipeline_mode = #tpu.pipeline_mode<synchronous>, transform_indices = @transform_6, window_bounds = array<i64: 1, 9>}, {transform_indices = @transform_7, window_bounds = array<i64: 8, 9>}]} {
    %c0 = arith.constant 0 : index
    %c0_0 = arith.constant 0 : index
    %0 = vector.load %arg1[%c0, %c0_0] : memref<8x32xf32, #tpu.memory_space<vmem>>, vector<8x32xf32>
    %c0_1 = arith.constant 0 : index
    %c0_2 = arith.constant 0 : index
    %1 = vector.load %arg2[%c0_1, %c0_2] : memref<32x32xf32, #tpu.memory_space<vmem>>, vector<32x32xf32>
    %cst = arith.constant dense<0.000000e+00> : vector<8x32xf32>
    %2 = tpu.matmul %0, %1, %cst {dimension_numbers = #tpu.dot_dimension_numbers<[1], [0], [0], [1], [0, 0, 1, 1], [], []>} : vector<8x32xf32>, vector<32x32xf32>, vector<8x32xf32> -> vector<8x32xf32>
    %c0_3 = arith.constant 0 : index
    %c0_4 = arith.constant 0 : index
    %3 = vector.load %arg3[%c0_3, %c0_4] : memref<1x32xf32, #tpu.memory_space<vmem>>, vector<1x32xf32>
    %4 = vector.broadcast %3 : vector<1x32xf32> to vector<8x32xf32>
    %5 = arith.addf %2, %4 : vector<8x32xf32>
    %cst_5 = arith.constant 0.000000e+00 : f32
    %6 = vector.broadcast %cst_5 : f32 to vector<8x32xf32>
    %7 = arith.maximumf %5, %6 : vector<8x32xf32>
    %c0_6 = arith.constant 0 : index
    %c0_7 = arith.constant 0 : index
    %8 = vector.load %arg4[%c0_6, %c0_7] : memref<32x32xf32, #tpu.memory_space<vmem>>, vector<32x32xf32>
    %cst_8 = arith.constant dense<0.000000e+00> : vector<8x32xf32>
    %9 = tpu.matmul %7, %8, %cst_8 {dimension_numbers = #tpu.dot_dimension_numbers<[1], [0], [0], [1], [0, 0, 1, 1], [], []>} : vector<8x32xf32>, vector<32x32xf32>, vector<8x32xf32> -> vector<8x32xf32>
    %c0_9 = arith.constant 0 : index
    %c0_10 = arith.constant 0 : index
    %10 = vector.load %arg5[%c0_9, %c0_10] : memref<1x32xf32, #tpu.memory_space<vmem>>, vector<1x32xf32>
    %11 = vector.broadcast %10 : vector<1x32xf32> to vector<8x32xf32>
    %12 = arith.addf %9, %11 : vector<8x32xf32>
    %cst_11 = arith.constant 0.000000e+00 : f32
    %13 = vector.broadcast %cst_11 : f32 to vector<8x32xf32>
    %14 = arith.maximumf %12, %13 : vector<8x32xf32>
    %c0_12 = arith.constant 0 : index
    %c0_13 = arith.constant 0 : index
    %15 = vector.load %arg6[%c0_12, %c0_13] : memref<32x9xf32, #tpu.memory_space<vmem>>, vector<32x9xf32>
    %cst_14 = arith.constant dense<0.000000e+00> : vector<8x9xf32>
    %16 = tpu.matmul %14, %15, %cst_14 {dimension_numbers = #tpu.dot_dimension_numbers<[1], [0], [0], [1], [0, 0, 1, 1], [], []>} : vector<8x32xf32>, vector<32x9xf32>, vector<8x9xf32> -> vector<8x9xf32>
    %c0_15 = arith.constant 0 : index
    %c0_16 = arith.constant 0 : index
    %17 = vector.load %arg7[%c0_15, %c0_16] : memref<1x9xf32, #tpu.memory_space<vmem>>, vector<1x9xf32>
    %18 = vector.broadcast %17 : vector<1x9xf32> to vector<8x9xf32>
    %19 = arith.addf %16, %18 : vector<8x9xf32>
    %cst_17 = arith.constant 0.000000e+00 : f32
    %20 = vector.broadcast %cst_17 : f32 to vector<8x9xf32>
    %21 = arith.maximumf %19, %20 : vector<8x9xf32>
    %c0_18 = arith.constant 0 : index
    %c0_19 = arith.constant 0 : index
    %22 = vector.load %arg8[%c0_18, %c0_19] : memref<8x9xf32, #tpu.memory_space<vmem>>, vector<8x9xf32>
    tpu.vector_store %arg8[%c0_18, %c0_19], %21 {strides = array<i32>} : memref<8x9xf32, #tpu.memory_space<vmem>>, vector<8x9xf32>,
    return
  }
  func.func @transform_0(%arg0: i32) -> (i32, i32) {
    %c0_i32 = arith.constant 0 : i32
    %c0_i32_0 = arith.constant 0 : i32
    return %arg0, %c0_i32 : i32, i32
  }
  func.func @transform_1(%arg0: i32) -> (i32, i32) {
    %c0_i32 = arith.constant 0 : i32
    %c0_i32_0 = arith.constant 0 : i32
    %c0_i32_1 = arith.constant 0 : i32
    return %c0_i32, %c0_i32_0 : i32, i32
  }
  func.func @transform_2(%arg0: i32) -> (i32, i32) {
    %c0_i32 = arith.constant 0 : i32
    %c0_i32_0 = arith.constant 0 : i32
    %c0_i32_1 = arith.constant 0 : i32
    return %c0_i32, %c0_i32_0 : i32, i32
  }
  func.func @transform_3(%arg0: i32) -> (i32, i32) {
    %c0_i32 = arith.constant 0 : i32
    %c0_i32_0 = arith.constant 0 : i32
    %c0_i32_1 = arith.constant 0 : i32
    return %c0_i32, %c0_i32_0 : i32, i32
  }
  func.func @transform_4(%arg0: i32) -> (i32, i32) {
    %c0_i32 = arith.constant 0 : i32
    %c0_i32_0 = arith.constant 0 : i32
    %c0_i32_1 = arith.constant 0 : i32
    return %c0_i32, %c0_i32_0 : i32, i32
  }
  func.func @transform_5(%arg0: i32) -> (i32, i32) {
    %c0_i32 = arith.constant 0 : i32
    %c0_i32_0 = arith.constant 0 : i32
    %c0_i32_1 = arith.constant 0 : i32
    return %c0_i32, %c0_i32_0 : i32, i32
  }
  func.func @transform_6(%arg0: i32) -> (i32, i32) {
    %c0_i32 = arith.constant 0 : i32
    %c0_i32_0 = arith.constant 0 : i32
    %c0_i32_1 = arith.constant 0 : i32
    return %c0_i32, %c0_i32_0 : i32, i32
  }
  func.func @transform_7(%arg0: i32) -> (i32, i32) {
    %c0_i32 = arith.constant 0 : i32
    %c0_i32_0 = arith.constant 0 : i32
    return %arg0, %c0_i32 : i32, i32
  }
}

</mosaic_0001>

<bundles_post_ra>
// kernel: chaser_forward.1
= control target key start
LH: loop header
LB: loop body
LE: loop exit
PB: predicated region body
PF: predicated region fallthrough
CT: control target
= control target key end

     0   :  { %12 = vsyncpa [#allocation3], 0  ;;  %s519_s0 = inlined_call_operand.vmem [shape: f32[2,32], index: 0, kind: input, shape index: {}]   ;;  %s520_s1 = inlined_call_operand.vmem [shape: f32[32,32], index: 1, kind: input, shape index: {}]   ;;  %s521_s2 = inlined_call_operand.vmem [shape: f32[1,32], index: 2, kind: input, shape index: {}]   ;;  %s522_s3 = inlined_call_operand.hbm [shape: f32[32,32], index: 3, kind: input, shape index: {}]   ;;  %s523_s4 = inlined_call_operand.vmem [shape: f32[1,32], index: 4, kind: input, shape index: {}]   ;;  %s524_s5 = inlined_call_operand.vmem [shape: f32[32,9], index: 5, kind: input, shape index: {}]   ;;  %s525_s6 = inlined_call_operand.vmem [shape: f32[1,9], index: 6, kind: input, shape index: {}]   ;;  %s526_s7 = inlined_call_operand.hbm [shape: f32[2,9], index: 7, kind: output, shape index: {}]  }
   0x1   :  { %13 = vsyncpa [#allocation4], 0  ;;  %s423_s24 = smov [#allocation2]  }
   0x2   :  { %s25_s25 = sshll.u32 %s423_s24, 4  ;;  %s26_s25 = int_to_ptr.vmem [resolvable:$true] %s25_s25 }
   0x3   :  { %s387_s26 = scalar_lea.vmem %s26_s25, 512  ;;  %p392_p1 = scmp.lt.s32.totalorder %s26_s25, %s26_s25 }
   0x4   :  { %p388_p0 = scmp.ne.s32.totalorder %s26_s25, %s387_s26  ;;  %p393_p2 = scmp.lt.s32.totalorder %s387_s26, %s387_s26 }
   0x6   :  { %p394_p3 = por %p393_p2, %p392_p1 }
   0x8   :  { %p395_p4 = pnand %p394_p3, %p388_p0 }
   0xa   :  { %398 = shalt.err (!%p395_p4)
}
   0xb   :  { %s424_s27 = smov 128   ;;  %s425_s28 = smov 8  }
   0xc   :  { %31 = dma.hbm_to_vmem [thread:$0]  %s522_s3, 512, %s26_s25, [#allocation3], %s424_s27, %s424_s27, %s425_s28  }
   0xd   :  { %419 = dma.done.wait [#allocation3], 512  }
   0xe   :  { %420 = vsyncadd [#allocation3], 4294966784  ;;  %v426_v0 = vmov 0.0   ;;  %vm427_vm0 = vmmov 0   ;;  %v45_v1 = vld [vmem:[%s520_s1 + $0x18] sm:$0xff]  ;;  %v44_v2 = vld [vmem:[%s520_s1 + $0x10] sm:$0xff] }
   0xf   :  { %338 = vmatprep.subr.mxu0 %v426_v0  ;;  %346 = vmatprep.mubr.msk.f32.mxu0 %vm427_vm0, %v426_v0  ;;  %v131_v3 = vld [vmem:[#allocation2 + $0x18] sm:$0xff]  ;;  %v43_v4 = vld [vmem:[%s520_s1 + $0x8] sm:$0xff]  ;;  %v42_v5 = vld [vmem:[%s520_s1] sm:$0xff]  ;;  %vm53_vm1 = vcmask 261120   ;;  %vm298_vm2 = vcmask 72704  }
  0x10   :  { %349 = vmatprep.subr.mxu1 %v426_v0  ;;  %357 = vmatprep.mubr.msk.f32.mxu1 %vm427_vm0, %v426_v0  ;;  %v41_v6 = vld [vmem:[%s519_s0] sm:$0xff]  ;;  %v130_v7 = vld [vmem:[#allocation2 + $0x10] sm:$0xff]  ;;  %v129_v8 = vld [vmem:[#allocation2 + $0x8] sm:$0xff] }
  0x11   :  { %339 = vmatpush3.msra.mxu0 %v45_v1  ;;  %350 = vmatpush3.msra.mxu1 %v131_v3  ;;  %v128_v9 = vld [vmem:[#allocation2] sm:$0xff]  ;;  %v216_v10 = vld [vmem:[%s524_s5 + $0x18] sm:$0xff]  ;;  %v215_v16 = vld [vmem:[%s524_s5 + $0x10] sm:$0xff] }
  0x12   :  { %340 = vmatprep.subr.mxu0 %v426_v0  ;;  %351 = vmatprep.subr.mxu1 %v426_v0  ;;  %v317_v11 = vld [vmem:[%s521_s2] ss:$0 sm:$0xff]  ;;  %v214_v17 = vld [vmem:[%s524_s5 + $0x8] sm:$0xff] }
  0x13   :  { %341 = vmatpush3.msra.mxu0 %v44_v2  ;;  %352 = vmatpush3.msra.mxu1 %v130_v7  ;;  %v213_v18 = vld [vmem:[%s524_s5] sm:$0xff] }
  0x14   :  { %342 = vmatprep.subr.mxu0 %v426_v0  ;;  %353 = vmatprep.subr.mxu1 %v426_v0  ;;  %v319_v19 = vld [vmem:[%s523_s4] ss:$0 sm:$0xff] }
  0x15   :  { %343 = vmatpush3.msra.mxu0 %v43_v4  ;;  %354 = vmatpush3.msra.mxu1 %v129_v8  ;;  %v321_v24 = vld [vmem:[%s525_s6] ss:$0 sm:$0xff] }
  0x16   :  { %344 = vmatprep.subr.mxu0 %v426_v0  ;;  %355 = vmatprep.subr.mxu1 %v426_v0 }
  0x17   :  { %345 = vmatpush3.msra.mxu0 %v42_v5  ;;  %356 = vmatpush3.msra.mxu1 %v128_v9 }
  0x18   :  { %347 = vmatmul.mubr.msk.f32.vlgmr.msra.gmra.mxu0 %vm53_vm1, %v41_v6  ;;  %360 = vmatprep.subr.mxu0 %v426_v0 }
  0x19   :  { %368 = vmatprep.mubr.msk.f32.mxu0 %vm427_vm0, %v426_v0  ;;  %361 = vmatpush3.msra.mxu0 %v216_v10 }
  0x1a   :  { %362 = vmatprep.subr.mxu0 %v426_v0 }
  0x1b   :  { %363 = vmatpush3.msra.mxu0 %v215_v16 }
  0x1c   :  { %364 = vmatprep.subr.mxu0 %v426_v0 }
  0x1d   :  { %365 = vmatpush3.msra.mxu0 %v214_v17 }
  0x1e   :  { %366 = vmatprep.subr.mxu0 %v426_v0 }
  0x1f   :  { %367 = vmatpush3.msra.mxu0 %v213_v18 }
  0xd8   :  { %v123_v12 = vpop.f32.mrf.mxu0 }
  0xd9   :  { %v124_v13 = vadd.f32 %v317_v11, %v123_v12 }
  0xda   :  { %v348_v14 = vpop.f32.mrf.mxu0 }
  0xdb   :  { %v127_v15 = vmax.f32 %v124_v13, 0.0 }
  0xdd   :  { %358 = vmatmul.mubr.msk.f32.vlgmr.msra.gmra.mxu1 %vm53_vm1, %v127_v15 }
 0x19d   :  { %v208_v20 = vpop.f32.mrf.mxu1 }
 0x19e   :  { %v209_v21 = vadd.f32 %v319_v19, %v208_v20 }
 0x19f   :  { %v359_v22 = vpop.f32.mrf.mxu1 }
 0x1a0   :  { %v212_v23 = vmax.f32 %v209_v21, 0.0 }
 0x1a2   :  { %369 = vmatmul.mubr.msk.f32.vlgmr.msra.gmra.mxu0 %vm53_vm1, %v212_v23 }
 0x262   :  { %v293_v25 = vpop.f32.mrf.mxu0 }
 0x263   :  { %v294_v26 = vadd.f32 %v321_v24, %v293_v25 }
 0x264   :  { %v370_v27 = vpop.f32.mrf.mxu0 }
 0x265   :  { %v297_v28 = vmax.f32 %v294_v26, 0.0 }
 0x267   :  { %299 = vst.msk [vmem:[#allocation5] sm:$0xff] %vm298_vm2, %v297_v28 }
 0x268   :  { %304 = vsyncadd [#allocation4], 96  ;;  %s428_s5 = smov [#allocation5]  }
 0x269   :  { %s305_s28 = sshll.u32 %s428_s5, 4  ;;  %s306_s28 = int_to_ptr.vmem [resolvable:$true] %s305_s28 }
 0x26a   :  { %s399_s4 = scalar_lea.vmem %s306_s28, 32  ;;  %s403_s29 = scalar_lea.vmem %s306_s28, 128 }
 0x26b   :  { %p400_p5 = scmp.ne.s32.totalorder %s306_s28, %s399_s4  ;;  %p404_p6 = scmp.lt.s32.totalorder %s306_s28, %s306_s28 }
 0x26c   :  { %p405_p7 = scmp.lt.s32.totalorder %s403_s29, %s399_s4 }
 0x26e   :  { %p406_p8 = por %p405_p7, %p404_p6 }
 0x270   :  { %p407_p9 = pnand %p406_p8, %p400_p5 }
 0x272   :  { %410 = shalt.err (!%p407_p9)
}
 0x273   :  { %s429_s30 = smov 32   ;;  %s430_s6 = smov 2  }
 0x274   :  { %311 = dma.vmem_to_hbm [thread:$0]  %s306_s28, 32, %s526_s7, [#allocation4], %s429_s30, %s429_s30, %s430_s6  }
 0x275   :  { %421 = dma.done.wait [#allocation4], 128  }
 0x276   :  { %422 = vsyncadd [#allocation4], 4294967168 }
 0x277   :  { %315 = vsyncpa [#allocation3], 1 }
 0x278   :  { %316 = vsyncpa [#allocation4], 1 }

</bundles_post_ra>
